<compile_context>
chip_gen: v5e
topology: v5e:2x2
jax: 0.10.0
libtpu: 0.0.40
codegen_flags: <defaults>
</compile_context>

<pallas_src>
import math
from functools import partial

import jax
import jax.numpy as jnp
from jax.experimental import pallas as pl
from jax.experimental.pallas import tpu as pltpu

# Model hyper-parameters (small, consistent with the module's __init__).
D_MODEL = 32
N_HEAD = 4
DIM_FF = 64
HEAD_DIM = D_MODEL // N_HEAD
LN_EPS = 1e-5  # torch.nn.LayerNorm default


def _layernorm(x, gamma, beta):
    mu = jnp.mean(x, axis=-1, keepdims=True)
    xc = x - mu
    var = jnp.mean(xc * xc, axis=-1, keepdims=True)
    inv = jax.lax.rsqrt(var + LN_EPS)
    return xc * inv * gamma + beta


def encoder_layer_kernel(src_ref, wqkv_ref, wo_ref, w1_ref, b1_ref, w2_ref,
                         b2_ref, g1_ref, be1_ref, g2_ref, be2_ref, out_ref,
                         *, seq_len, matmul_dtype):
    R, D = src_ref.shape                  # R = batch_block * seq_len (folded rows)
    bt = R // seq_len                     # batch elements in this block

    def mm(a, b):
        # MXU matmul; optionally cast inputs (bf16 on v6e/v7x), accumulate f32.
        return jnp.dot(a.astype(matmul_dtype), b.astype(matmul_dtype),
                       preferred_element_type=jnp.float32)

    x = src_ref[...]                                        # (R, D) f32

    # ---- fused QKV projection: one MXU push, 3*D output lanes ----
    qkv = mm(x, wqkv_ref[...])                              # (R, 3D)
    q = qkv[:, 0 * D:1 * D]
    k = qkv[:, 1 * D:2 * D]
    v = qkv[:, 2 * D:3 * D]

    # ---- scaled dot-product attention (no mask, eval-mode dropout) ----
    # TODO(synk): attention mask / need_weights path not implemented.
    scale = 1.0 / math.sqrt(HEAD_DIM)
    batch_rows = []
    for b in range(bt):                                     # static unroll
        rs = slice(b * seq_len, (b + 1) * seq_len)
        head_outs = []
        for h in range(N_HEAD):                             # static unroll
            cs = slice(h * HEAD_DIM, (h + 1) * HEAD_DIM)
            qh, kh, vh = q[rs, cs], k[rs, cs], v[rs, cs]
            logits = mm(qh, kh.T) * scale                   # (S, S) f32
            logits = logits - jnp.max(logits, axis=-1, keepdims=True)
            p = jnp.exp(logits)
            p = p / jnp.sum(p, axis=-1, keepdims=True)      # f32 softmax
            head_outs.append(mm(p, vh))                     # (S, HEAD_DIM)
        batch_rows.append(jnp.concatenate(head_outs, axis=-1))  # (S, D)
    attn = jnp.concatenate(batch_rows, axis=0)              # (R, D)

    # attention output projection (single MXU push over all R rows)
    src2 = mm(attn, wo_ref[...])

    # dropout1 = identity (eval); residual + norm1 (f32)
    x1 = _layernorm(x + src2, g1_ref[...], be1_ref[...])

    # ---- feed-forward: linear1 -> ReLU -> (dropout=id) -> linear2 ----
    h1 = jnp.maximum(mm(x1, w1_ref[...]) + b1_ref[...], 0.0)
    ff = mm(h1, w2_ref[...]) + b2_ref[...]

    # dropout2 = identity; residual + norm2
    out_ref[...] = _layernorm(x1 + ff, g2_ref[...], be2_ref[...]).astype(out_ref.dtype)


def transformer_encoder_layer(src, params, *, batch_block=None,
                              matmul_dtype=jnp.float32):
    """src: (B, S, D). params: [wqkv, wo, w1, b1, w2, b2, g1, be1, g2, be2]."""
    B, S, D = src.shape
    if batch_block is None:
        batch_block = B                   # single grid step by default
    assert B % batch_block == 0
    grid = (B // batch_block,)
    rows = batch_block * S

    # Fold (batch, seq) into rows in the wrapper (pure layout plumbing).
    src2d = src.reshape(B * S, D)

    def rep_spec(p):
        # grid-invariant weights / biases / LN params: always block (0, ..., 0)
        return pl.BlockSpec(p.shape, lambda i, _n=p.ndim: (0,) * _n)

    in_specs = [pl.BlockSpec((rows, D), lambda i: (i, 0))]
    in_specs += [rep_spec(p) for p in params]
    out_specs = pl.BlockSpec((rows, D), lambda i: (i, 0))

    kernel = partial(encoder_layer_kernel, seq_len=S, matmul_dtype=matmul_dtype)
    out2d = pl.pallas_call(
        kernel,
        out_shape=jax.ShapeDtypeStruct((B * S, D), src.dtype),
        grid=grid,
        in_specs=in_specs,
        out_specs=out_specs,
        compiler_params=pltpu.CompilerParams(
            dimension_semantics=("parallel",)),
    )(src2d, *params)
    return out2d.reshape(B, S, D)


def init_params(key):
    """Deterministic parameter init mirroring the module's reset_parameters."""
    ks = jax.random.split(key, 8)

    def xavier(k, fan_in, fan_out, gain=1.0):
        bound = gain * math.sqrt(6.0 / (fan_in + fan_out))
        return jax.random.uniform(k, (fan_in, fan_out), jnp.float32, -bound, bound)

    # attention projections (bias-free), xavier_uniform; Q/K/V packed as (D, 3D)
    wq = xavier(ks[0], D_MODEL, D_MODEL)
    wk = xavier(ks[1], D_MODEL, D_MODEL)
    wv = xavier(ks[2], D_MODEL, D_MODEL)
    wqkv = jnp.concatenate([wq, wk, wv], axis=1)
    wo = xavier(ks[3], D_MODEL, D_MODEL)
    # linear1: xavier_uniform with ReLU gain; linear2: xavier_uniform gain 1
    w1 = xavier(ks[4], D_MODEL, DIM_FF, gain=math.sqrt(2.0))
    w2 = xavier(ks[5], DIM_FF, D_MODEL, gain=1.0)
    # biases: PyTorch Linear default uniform(-1/sqrt(fan_in), 1/sqrt(fan_in))
    b1 = jax.random.uniform(ks[6], (1, DIM_FF), jnp.float32,
                            -1.0 / math.sqrt(D_MODEL), 1.0 / math.sqrt(D_MODEL))
    b2 = jax.random.uniform(ks[7], (1, D_MODEL), jnp.float32,
                            -1.0 / math.sqrt(DIM_FF), 1.0 / math.sqrt(DIM_FF))
    # LayerNorm affine params
    g1 = jnp.ones((1, D_MODEL), jnp.float32)
    be1 = jnp.zeros((1, D_MODEL), jnp.float32)
    g2 = jnp.ones((1, D_MODEL), jnp.float32)
    be2 = jnp.zeros((1, D_MODEL), jnp.float32)
    return [wqkv, wo, w1, b1, w2, b2, g1, be1, g2, be2]


def reference(src, params):
    """Pure-JAX reference for correctness check."""
    wqkv, wo, w1, b1, w2, b2, g1, be1, g2, be2 = params
    wq = wqkv[:, 0 * D_MODEL:1 * D_MODEL]
    wk = wqkv[:, 1 * D_MODEL:2 * D_MODEL]
    wv = wqkv[:, 2 * D_MODEL:3 * D_MODEL]

    def ln(x, g, b):
        mu = x.mean(-1, keepdims=True)
        var = ((x - mu) ** 2).mean(-1, keepdims=True)
        return (x - mu) / jnp.sqrt(var + LN_EPS) * g + b

    B, S, D = src.shape
    q = (src @ wq).reshape(B, S, N_HEAD, HEAD_DIM).transpose(0, 2, 1, 3)
    k = (src @ wk).reshape(B, S, N_HEAD, HEAD_DIM).transpose(0, 2, 1, 3)
    v = (src @ wv).reshape(B, S, N_HEAD, HEAD_DIM).transpose(0, 2, 1, 3)
    logits = jnp.einsum('bhsd,bhtd->bhst', q, k) / math.sqrt(HEAD_DIM)
    p = jax.nn.softmax(logits, axis=-1)
    attn = jnp.einsum('bhst,bhtd->bhsd', p, v).transpose(0, 2, 1, 3).reshape(B, S, D)
    x = ln(src + attn @ wo, g1, be1)
    ff = jnp.maximum(x @ w1 + b1, 0.0) @ w2 + b2
    return ln(x + ff, g2, be2)


if __name__ == "__main__":
    key = jax.random.PRNGKey(0)
    k_param, k_src = jax.random.split(key)

    B, S = 2, 8
    src = jax.random.normal(k_src, (B, S, D_MODEL), jnp.float32)
    params = init_params(k_param)

    out = transformer_encoder_layer(src, params)
    out = jax.block_until_ready(out)

    ref = reference(src, params)
    assert out.shape == (B, S, D_MODEL)
    assert jnp.allclose(out, ref, atol=1e-4, rtol=1e-4), "mismatch vs reference"

    # TODO(synk): attention mask / need_weights path and dropout (train mode)
    # not implemented; D_MODEL=32 is module-fixed so output lanes stay 32-wide.
    print("KERNEL_OK")
</pallas_src>

<mosaic_0001>
module attributes {stable_mosaic.version = 11 : i64} {
  func.func @encoder_layer_kernel(%arg0: i32, %arg1: memref<16x32xf32, #tpu.memory_space<vmem>>, %arg2: memref<32x96xf32, #tpu.memory_space<vmem>>, %arg3: memref<32x32xf32, #tpu.memory_space<vmem>>, %arg4: memref<32x64xf32, #tpu.memory_space<vmem>>, %arg5: memref<1x64xf32, #tpu.memory_space<vmem>>, %arg6: memref<64x32xf32, #tpu.memory_space<vmem>>, %arg7: memref<1x32xf32, #tpu.memory_space<vmem>>, %arg8: memref<1x32xf32, #tpu.memory_space<vmem>>, %arg9: memref<1x32xf32, #tpu.memory_space<vmem>>, %arg10: memref<1x32xf32, #tpu.memory_space<vmem>>, %arg11: memref<1x32xf32, #tpu.memory_space<vmem>>, %arg12: memref<16x32xf32, #tpu.memory_space<vmem>>) attributes {dimension_semantics = [#tpu.dimension_semantics<parallel>], iteration_bounds = array<i64: 1>, scalar_prefetch = 0 : i64, scratch_operands = 0 : i64, tpu.core_type = #tpu.core_type<tc>, window_params = [{transform_indices = @transform_0, window_bounds = array<i64: 16, 32>}, {pipeline_mode = #tpu.pipeline_mode<synchronous>, transform_indices = @transform_1, window_bounds = array<i64: 32, 96>}, {pipeline_mode = #tpu.pipeline_mode<synchronous>, transform_indices = @transform_2, window_bounds = array<i64: 32, 32>}, {pipeline_mode = #tpu.pipeline_mode<synchronous>, transform_indices = @transform_3, window_bounds = array<i64: 32, 64>}, {pipeline_mode = #tpu.pipeline_mode<synchronous>, transform_indices = @transform_4, window_bounds = array<i64: 1, 64>}, {pipeline_mode = #tpu.pipeline_mode<synchronous>, transform_indices = @transform_5, window_bounds = array<i64: 64, 32>}, {pipeline_mode = #tpu.pipeline_mode<synchronous>, transform_indices = @transform_6, window_bounds = array<i64: 1, 32>}, {pipeline_mode = #tpu.pipeline_mode<synchronous>, transform_indices = @transform_7, window_bounds = array<i64: 1, 32>}, {pipeline_mode = #tpu.pipeline_mode<synchronous>, transform_indices = @transform_8, window_bounds = array<i64: 1, 32>}, {pipeline_mode = #tpu.pipeline_mode<synchronous>, transform_indices = @transform_9, window_bounds = array<i64: 1, 32>}, {pipeline_mode = #tpu.pipeline_mode<synchronous>, transform_indices = @transform_10, window_bounds = array<i64: 1, 32>}, {transform_indices = @transform_11, window_bounds = array<i64: 16, 32>}]} {
    %c0 = arith.constant 0 : index
    %c0_0 = arith.constant 0 : index
    %0 = vector.load %arg1[%c0, %c0_0] : memref<16x32xf32, #tpu.memory_space<vmem>>, vector<16x32xf32>
    %c0_1 = arith.constant 0 : index
    %c0_2 = arith.constant 0 : index
    %1 = vector.load %arg2[%c0_1, %c0_2] : memref<32x96xf32, #tpu.memory_space<vmem>>, vector<32x96xf32>
    %cst = arith.constant dense<0.000000e+00> : vector<16x96xf32>
    %2 = tpu.matmul %0, %1, %cst {dimension_numbers = #tpu.dot_dimension_numbers<[1], [0], [0], [1], [0, 0, 1, 1], [], []>} : vector<16x32xf32>, vector<32x96xf32>, vector<16x96xf32> -> vector<16x96xf32>
    %3 = vector.extract_strided_slice %2 {offsets = [0, 0], sizes = [16, 32], strides = [1, 1]} : vector<16x96xf32> to vector<16x32xf32>
    %4 = vector.extract_strided_slice %2 {offsets = [0, 32], sizes = [16, 32], strides = [1, 1]} : vector<16x96xf32> to vector<16x32xf32>
    %5 = vector.extract_strided_slice %2 {offsets = [0, 64], sizes = [16, 32], strides = [1, 1]} : vector<16x96xf32> to vector<16x32xf32>
    %6 = vector.extract_strided_slice %3 {offsets = [0, 0], sizes = [8, 8], strides = [1, 1]} : vector<16x32xf32> to vector<8x8xf32>
    %7 = vector.extract_strided_slice %4 {offsets = [0, 0], sizes = [8, 8], strides = [1, 1]} : vector<16x32xf32> to vector<8x8xf32>
    %8 = vector.extract_strided_slice %5 {offsets = [0, 0], sizes = [8, 8], strides = [1, 1]} : vector<16x32xf32> to vector<8x8xf32>
    %9 = tpu.transpose %7, [1, 0] : vector<8x8xf32> -> vector<8x8xf32>
    %cst_3 = arith.constant dense<0.000000e+00> : vector<8x8xf32>
    %10 = tpu.matmul %6, %9, %cst_3 {dimension_numbers = #tpu.dot_dimension_numbers<[1], [0], [0], [1], [0, 0, 1, 1], [], []>} : vector<8x8xf32>, vector<8x8xf32>, vector<8x8xf32> -> vector<8x8xf32>
    %cst_4 = arith.constant 0.353553385 : f32
    %11 = vector.broadcast %cst_4 : f32 to vector<8x8xf32>
    %12 = arith.mulf %10, %11 : vector<8x8xf32>
    %cst_5 = arith.constant dense<0xFF800000> : vector<8xf32>
    %13 = vector.multi_reduction <maximumf>, %12, %cst_5 [1] : vector<8x8xf32> to vector<8xf32>
    %14 = vector.shape_cast %13 : vector<8xf32> to vector<8x1xf32>
    %15 = vector.broadcast %14 : vector<8x1xf32> to vector<8x8xf32>
    %16 = arith.subf %12, %15 : vector<8x8xf32>
    %17 = math.exp %16 : vector<8x8xf32>
    %cst_6 = arith.constant dense<0.000000e+00> : vector<8xf32>
    %18 = vector.multi_reduction <add>, %17, %cst_6 [1] : vector<8x8xf32> to vector<8xf32>
    %19 = vector.shape_cast %18 : vector<8xf32> to vector<8x1xf32>
    %20 = vector.broadcast %19 : vector<8x1xf32> to vector<8x8xf32>
    %21 = arith.divf %17, %20 : vector<8x8xf32>
    %cst_7 = arith.constant dense<0.000000e+00> : vector<8x8xf32>
    %22 = tpu.matmul %21, %8, %cst_7 {dimension_numbers = #tpu.dot_dimension_numbers<[1], [0], [0], [1], [0, 0, 1, 1], [], []>} : vector<8x8xf32>, vector<8x8xf32>, vector<8x8xf32> -> vector<8x8xf32>
    %23 = vector.extract_strided_slice %3 {offsets = [0, 8], sizes = [8, 8], strides = [1, 1]} : vector<16x32xf32> to vector<8x8xf32>
    %24 = vector.extract_strided_slice %4 {offsets = [0, 8], sizes = [8, 8], strides = [1, 1]} : vector<16x32xf32> to vector<8x8xf32>
    %25 = vector.extract_strided_slice %5 {offsets = [0, 8], sizes = [8, 8], strides = [1, 1]} : vector<16x32xf32> to vector<8x8xf32>
    %26 = tpu.transpose %24, [1, 0] : vector<8x8xf32> -> vector<8x8xf32>
    %cst_8 = arith.constant dense<0.000000e+00> : vector<8x8xf32>
    %27 = tpu.matmul %23, %26, %cst_8 {dimension_numbers = #tpu.dot_dimension_numbers<[1], [0], [0], [1], [0, 0, 1, 1], [], []>} : vector<8x8xf32>, vector<8x8xf32>, vector<8x8xf32> -> vector<8x8xf32>
    %cst_9 = arith.constant 0.353553385 : f32
    %28 = vector.broadcast %cst_9 : f32 to vector<8x8xf32>
    %29 = arith.mulf %27, %28 : vector<8x8xf32>
    %cst_10 = arith.constant dense<0xFF800000> : vector<8xf32>
    %30 = vector.multi_reduction <maximumf>, %29, %cst_10 [1] : vector<8x8xf32> to vector<8xf32>
    %31 = vector.shape_cast %30 : vector<8xf32> to vector<8x1xf32>
    %32 = vector.broadcast %31 : vector<8x1xf32> to vector<8x8xf32>
    %33 = arith.subf %29, %32 : vector<8x8xf32>
    %34 = math.exp %33 : vector<8x8xf32>
    %cst_11 = arith.constant dense<0.000000e+00> : vector<8xf32>
    %35 = vector.multi_reduction <add>, %34, %cst_11 [1] : vector<8x8xf32> to vector<8xf32>
    %36 = vector.shape_cast %35 : vector<8xf32> to vector<8x1xf32>
    %37 = vector.broadcast %36 : vector<8x1xf32> to vector<8x8xf32>
    %38 = arith.divf %34, %37 : vector<8x8xf32>
    %cst_12 = arith.constant dense<0.000000e+00> : vector<8x8xf32>
    %39 = tpu.matmul %38, %25, %cst_12 {dimension_numbers = #tpu.dot_dimension_numbers<[1], [0], [0], [1], [0, 0, 1, 1], [], []>} : vector<8x8xf32>, vector<8x8xf32>, vector<8x8xf32> -> vector<8x8xf32>
    %40 = vector.extract_strided_slice %3 {offsets = [0, 16], sizes = [8, 8], strides = [1, 1]} : vector<16x32xf32> to vector<8x8xf32>
    %41 = vector.extract_strided_slice %4 {offsets = [0, 16], sizes = [8, 8], strides = [1, 1]} : vector<16x32xf32> to vector<8x8xf32>
    %42 = vector.extract_strided_slice %5 {offsets = [0, 16], sizes = [8, 8], strides = [1, 1]} : vector<16x32xf32> to vector<8x8xf32>
    %43 = tpu.transpose %41, [1, 0] : vector<8x8xf32> -> vector<8x8xf32>
    %cst_13 = arith.constant dense<0.000000e+00> : vector<8x8xf32>
    %44 = tpu.matmul %40, %43, %cst_13 {dimension_numbers = #tpu.dot_dimension_numbers<[1], [0], [0], [1], [0, 0, 1, 1], [], []>} : vector<8x8xf32>, vector<8x8xf32>, vector<8x8xf32> -> vector<8x8xf32>
    %cst_14 = arith.constant 0.353553385 : f32
    %45 = vector.broadcast %cst_14 : f32 to vector<8x8xf32>
    %46 = arith.mulf %44, %45 : vector<8x8xf32>
    %cst_15 = arith.constant dense<0xFF800000> : vector<8xf32>
    %47 = vector.multi_reduction <maximumf>, %46, %cst_15 [1] : vector<8x8xf32> to vector<8xf32>
    %48 = vector.shape_cast %47 : vector<8xf32> to vector<8x1xf32>
    %49 = vector.broadcast %48 : vector<8x1xf32> to vector<8x8xf32>
    %50 = arith.subf %46, %49 : vector<8x8xf32>
    %51 = math.exp %50 : vector<8x8xf32>
    %cst_16 = arith.constant dense<0.000000e+00> : vector<8xf32>
    %52 = vector.multi_reduction <add>, %51, %cst_16 [1] : vector<8x8xf32> to vector<8xf32>
    %53 = vector.shape_cast %52 : vector<8xf32> to vector<8x1xf32>
    %54 = vector.broadcast %53 : vector<8x1xf32> to vector<8x8xf32>
    %55 = arith.divf %51, %54 : vector<8x8xf32>
    %cst_17 = arith.constant dense<0.000000e+00> : vector<8x8xf32>
    %56 = tpu.matmul %55, %42, %cst_17 {dimension_numbers = #tpu.dot_dimension_numbers<[1], [0], [0], [1], [0, 0, 1, 1], [], []>} : vector<8x8xf32>, vector<8x8xf32>, vector<8x8xf32> -> vector<8x8xf32>
    %57 = vector.extract_strided_slice %3 {offsets = [0, 24], sizes = [8, 8], strides = [1, 1]} : vector<16x32xf32> to vector<8x8xf32>
    %58 = vector.extract_strided_slice %4 {offsets = [0, 24], sizes = [8, 8], strides = [1, 1]} : vector<16x32xf32> to vector<8x8xf32>
    %59 = vector.extract_strided_slice %5 {offsets = [0, 24], sizes = [8, 8], strides = [1, 1]} : vector<16x32xf32> to vector<8x8xf32>
    %60 = tpu.transpose %58, [1, 0] : vector<8x8xf32> -> vector<8x8xf32>
    %cst_18 = arith.constant dense<0.000000e+00> : vector<8x8xf32>
    %61 = tpu.matmul %57, %60, %cst_18 {dimension_numbers = #tpu.dot_dimension_numbers<[1], [0], [0], [1], [0, 0, 1, 1], [], []>} : vector<8x8xf32>, vector<8x8xf32>, vector<8x8xf32> -> vector<8x8xf32>
    %cst_19 = arith.constant 0.353553385 : f32
    %62 = vector.broadcast %cst_19 : f32 to vector<8x8xf32>
    %63 = arith.mulf %61, %62 : vector<8x8xf32>
    %cst_20 = arith.constant dense<0xFF800000> : vector<8xf32>
    %64 = vector.multi_reduction <maximumf>, %63, %cst_20 [1] : vector<8x8xf32> to vector<8xf32>
    %65 = vector.shape_cast %64 : vector<8xf32> to vector<8x1xf32>
    %66 = vector.broadcast %65 : vector<8x1xf32> to vector<8x8xf32>
    %67 = arith.subf %63, %66 : vector<8x8xf32>
    %68 = math.exp %67 : vector<8x8xf32>
    %cst_21 = arith.constant dense<0.000000e+00> : vector<8xf32>
    %69 = vector.multi_reduction <add>, %68, %cst_21 [1] : vector<8x8xf32> to vector<8xf32>
    %70 = vector.shape_cast %69 : vector<8xf32> to vector<8x1xf32>
    %71 = vector.broadcast %70 : vector<8x1xf32> to vector<8x8xf32>
    %72 = arith.divf %68, %71 : vector<8x8xf32>
    %cst_22 = arith.constant dense<0.000000e+00> : vector<8x8xf32>
    %73 = tpu.matmul %72, %59, %cst_22 {dimension_numbers = #tpu.dot_dimension_numbers<[1], [0], [0], [1], [0, 0, 1, 1], [], []>} : vector<8x8xf32>, vector<8x8xf32>, vector<8x8xf32> -> vector<8x8xf32>
    %74 = tpu.concatenate %22, %39, %56, %73 in 1 : vector<8x8xf32>, vector<8x8xf32>, vector<8x8xf32>, vector<8x8xf32> -> vector<8x32xf32>
    %75 = vector.extract_strided_slice %3 {offsets = [8, 0], sizes = [8, 8], strides = [1, 1]} : vector<16x32xf32> to vector<8x8xf32>
    %76 = vector.extract_strided_slice %4 {offsets = [8, 0], sizes = [8, 8], strides = [1, 1]} : vector<16x32xf32> to vector<8x8xf32>
    %77 = vector.extract_strided_slice %5 {offsets = [8, 0], sizes = [8, 8], strides = [1, 1]} : vector<16x32xf32> to vector<8x8xf32>
    %78 = tpu.transpose %76, [1, 0] : vector<8x8xf32> -> vector<8x8xf32>
    %cst_23 = arith.constant dense<0.000000e+00> : vector<8x8xf32>
    %79 = tpu.matmul %75, %78, %cst_23 {dimension_numbers = #tpu.dot_dimension_numbers<[1], [0], [0], [1], [0, 0, 1, 1], [], []>} : vector<8x8xf32>, vector<8x8xf32>, vector<8x8xf32> -> vector<8x8xf32>
    %cst_24 = arith.constant 0.353553385 : f32
    %80 = vector.broadcast %cst_24 : f32 to vector<8x8xf32>
    %81 = arith.mulf %79, %80 : vector<8x8xf32>
    %cst_25 = arith.constant dense<0xFF800000> : vector<8xf32>
    %82 = vector.multi_reduction <maximumf>, %81, %cst_25 [1] : vector<8x8xf32> to vector<8xf32>
    %83 = vector.shape_cast %82 : vector<8xf32> to vector<8x1xf32>
    %84 = vector.broadcast %83 : vector<8x1xf32> to vector<8x8xf32>
    %85 = arith.subf %81, %84 : vector<8x8xf32>
    %86 = math.exp %85 : vector<8x8xf32>
    %cst_26 = arith.constant dense<0.000000e+00> : vector<8xf32>
    %87 = vector.multi_reduction <add>, %86, %cst_26 [1] : vector<8x8xf32> to vector<8xf32>
    %88 = vector.shape_cast %87 : vector<8xf32> to vector<8x1xf32>
    %89 = vector.broadcast %88 : vector<8x1xf32> to vector<8x8xf32>
    %90 = arith.divf %86, %89 : vector<8x8xf32>
    %cst_27 = arith.constant dense<0.000000e+00> : vector<8x8xf32>
    %91 = tpu.matmul %90, %77, %cst_27 {dimension_numbers = #tpu.dot_dimension_numbers<[1], [0], [0], [1], [0, 0, 1, 1], [], []>} : vector<8x8xf32>, vector<8x8xf32>, vector<8x8xf32> -> vector<8x8xf32>
    %92 = vector.extract_strided_slice %3 {offsets = [8, 8], sizes = [8, 8], strides = [1, 1]} : vector<16x32xf32> to vector<8x8xf32>
    %93 = vector.extract_strided_slice %4 {offsets = [8, 8], sizes = [8, 8], strides = [1, 1]} : vector<16x32xf32> to vector<8x8xf32>
    %94 = vector.extract_strided_slice %5 {offsets = [8, 8], sizes = [8, 8], strides = [1, 1]} : vector<16x32xf32> to vector<8x8xf32>
    %95 = tpu.transpose %93, [1, 0] : vector<8x8xf32> -> vector<8x8xf32>
    %cst_28 = arith.constant dense<0.000000e+00> : vector<8x8xf32>
    %96 = tpu.matmul %92, %95, %cst_28 {dimension_numbers = #tpu.dot_dimension_numbers<[1], [0], [0], [1], [0, 0, 1, 1], [], []>} : vector<8x8xf32>, vector<8x8xf32>, vector<8x8xf32> -> vector<8x8xf32>
    %cst_29 = arith.constant 0.353553385 : f32
    %97 = vector.broadcast %cst_29 : f32 to vector<8x8xf32>
    %98 = arith.mulf %96, %97 : vector<8x8xf32>
    %cst_30 = arith.constant dense<0xFF800000> : vector<8xf32>
    %99 = vector.multi_reduction <maximumf>, %98, %cst_30 [1] : vector<8x8xf32> to vector<8xf32>
    %100 = vector.shape_cast %99 : vector<8xf32> to vector<8x1xf32>
    %101 = vector.broadcast %100 : vector<8x1xf32> to vector<8x8xf32>
    %102 = arith.subf %98, %101 : vector<8x8xf32>
    %103 = math.exp %102 : vector<8x8xf32>
    %cst_31 = arith.constant dense<0.000000e+00> : vector<8xf32>
    %104 = vector.multi_reduction <add>, %103, %cst_31 [1] : vector<8x8xf32> to vector<8xf32>
    %105 = vector.shape_cast %104 : vector<8xf32> to vector<8x1xf32>
    %106 = vector.broadcast %105 : vector<8x1xf32> to vector<8x8xf32>
    %107 = arith.divf %103, %106 : vector<8x8xf32>
    %cst_32 = arith.constant dense<0.000000e+00> : vector<8x8xf32>
    %108 = tpu.matmul %107, %94, %cst_32 {dimension_numbers = #tpu.dot_dimension_numbers<[1], [0], [0], [1], [0, 0, 1, 1], [], []>} : vector<8x8xf32>, vector<8x8xf32>, vector<8x8xf32> -> vector<8x8xf32>
    %109 = vector.extract_strided_slice %3 {offsets = [8, 16], sizes = [8, 8], strides = [1, 1]} : vector<16x32xf32> to vector<8x8xf32>
    %110 = vector.extract_strided_slice %4 {offsets = [8, 16], sizes = [8, 8], strides = [1, 1]} : vector<16x32xf32> to vector<8x8xf32>
    %111 = vector.extract_strided_slice %5 {offsets = [8, 16], sizes = [8, 8], strides = [1, 1]} : vector<16x32xf32> to vector<8x8xf32>
    %112 = tpu.transpose %110, [1, 0] : vector<8x8xf32> -> vector<8x8xf32>
    %cst_33 = arith.constant dense<0.000000e+00> : vector<8x8xf32>
    %113 = tpu.matmul %109, %112, %cst_33 {dimension_numbers = #tpu.dot_dimension_numbers<[1], [0], [0], [1], [0, 0, 1, 1], [], []>} : vector<8x8xf32>, vector<8x8xf32>, vector<8x8xf32> -> vector<8x8xf32>
    %cst_34 = arith.constant 0.353553385 : f32
    %114 = vector.broadcast %cst_34 : f32 to vector<8x8xf32>
    %115 = arith.mulf %113, %114 : vector<8x8xf32>
    %cst_35 = arith.constant dense<0xFF800000> : vector<8xf32>
    %116 = vector.multi_reduction <maximumf>, %115, %cst_35 [1] : vector<8x8xf32> to vector<8xf32>
    %117 = vector.shape_cast %116 : vector<8xf32> to vector<8x1xf32>
    %118 = vector.broadcast %117 : vector<8x1xf32> to vector<8x8xf32>
    %119 = arith.subf %115, %118 : vector<8x8xf32>
    %120 = math.exp %119 : vector<8x8xf32>
    %cst_36 = arith.constant dense<0.000000e+00> : vector<8xf32>
    %121 = vector.multi_reduction <add>, %120, %cst_36 [1] : vector<8x8xf32> to vector<8xf32>
    %122 = vector.shape_cast %121 : vector<8xf32> to vector<8x1xf32>
    %123 = vector.broadcast %122 : vector<8x1xf32> to vector<8x8xf32>
    %124 = arith.divf %120, %123 : vector<8x8xf32>
    %cst_37 = arith.constant dense<0.000000e+00> : vector<8x8xf32>
    %125 = tpu.matmul %124, %111, %cst_37 {dimension_numbers = #tpu.dot_dimension_numbers<[1], [0], [0], [1], [0, 0, 1, 1], [], []>} : vector<8x8xf32>, vector<8x8xf32>, vector<8x8xf32> -> vector<8x8xf32>
    %126 = vector.extract_strided_slice %3 {offsets = [8, 24], sizes = [8, 8], strides = [1, 1]} : vector<16x32xf32> to vector<8x8xf32>
    %127 = vector.extract_strided_slice %4 {offsets = [8, 24], sizes = [8, 8], strides = [1, 1]} : vector<16x32xf32> to vector<8x8xf32>
    %128 = vector.extract_strided_slice %5 {offsets = [8, 24], sizes = [8, 8], strides = [1, 1]} : vector<16x32xf32> to vector<8x8xf32>
    %129 = tpu.transpose %127, [1, 0] : vector<8x8xf32> -> vector<8x8xf32>
    %cst_38 = arith.constant dense<0.000000e+00> : vector<8x8xf32>
    %130 = tpu.matmul %126, %129, %cst_38 {dimension_numbers = #tpu.dot_dimension_numbers<[1], [0], [0], [1], [0, 0, 1, 1], [], []>} : vector<8x8xf32>, vector<8x8xf32>, vector<8x8xf32> -> vector<8x8xf32>
    %cst_39 = arith.constant 0.353553385 : f32
    %131 = vector.broadcast %cst_39 : f32 to vector<8x8xf32>
    %132 = arith.mulf %130, %131 : vector<8x8xf32>
    %cst_40 = arith.constant dense<0xFF800000> : vector<8xf32>
    %133 = vector.multi_reduction <maximumf>, %132, %cst_40 [1] : vector<8x8xf32> to vector<8xf32>
    %134 = vector.shape_cast %133 : vector<8xf32> to vector<8x1xf32>
    %135 = vector.broadcast %134 : vector<8x1xf32> to vector<8x8xf32>
    %136 = arith.subf %132, %135 : vector<8x8xf32>
    %137 = math.exp %136 : vector<8x8xf32>
    %cst_41 = arith.constant dense<0.000000e+00> : vector<8xf32>
    %138 = vector.multi_reduction <add>, %137, %cst_41 [1] : vector<8x8xf32> to vector<8xf32>
    %139 = vector.shape_cast %138 : vector<8xf32> to vector<8x1xf32>
    %140 = vector.broadcast %139 : vector<8x1xf32> to vector<8x8xf32>
    %141 = arith.divf %137, %140 : vector<8x8xf32>
    %cst_42 = arith.constant dense<0.000000e+00> : vector<8x8xf32>
    %142 = tpu.matmul %141, %128, %cst_42 {dimension_numbers = #tpu.dot_dimension_numbers<[1], [0], [0], [1], [0, 0, 1, 1], [], []>} : vector<8x8xf32>, vector<8x8xf32>, vector<8x8xf32> -> vector<8x8xf32>
    %143 = tpu.concatenate %91, %108, %125, %142 in 1 : vector<8x8xf32>, vector<8x8xf32>, vector<8x8xf32>, vector<8x8xf32> -> vector<8x32xf32>
    %144 = tpu.concatenate %74, %143 in 0 : vector<8x32xf32>, vector<8x32xf32> -> vector<16x32xf32>
    %c0_43 = arith.constant 0 : index
    %c0_44 = arith.constant 0 : index
    %145 = vector.load %arg3[%c0_43, %c0_44] : memref<32x32xf32, #tpu.memory_space<vmem>>, vector<32x32xf32>
    %cst_45 = arith.constant dense<0.000000e+00> : vector<16x32xf32>
    %146 = tpu.matmul %144, %145, %cst_45 {dimension_numbers = #tpu.dot_dimension_numbers<[1], [0], [0], [1], [0, 0, 1, 1], [], []>} : vector<16x32xf32>, vector<32x32xf32>, vector<16x32xf32> -> vector<16x32xf32>
    %147 = arith.addf %0, %146 : vector<16x32xf32>
    %c0_46 = arith.constant 0 : index
    %c0_47 = arith.constant 0 : index
    %148 = vector.load %arg8[%c0_46, %c0_47] : memref<1x32xf32, #tpu.memory_space<vmem>>, vector<1x32xf32>
    %c0_48 = arith.constant 0 : index
    %c0_49 = arith.constant 0 : index
    %149 = vector.load %arg9[%c0_48, %c0_49] : memref<1x32xf32, #tpu.memory_space<vmem>>, vector<1x32xf32>
    %cst_50 = arith.constant dense<0.000000e+00> : vector<16xf32>
    %150 = vector.multi_reduction <add>, %147, %cst_50 [1] : vector<16x32xf32> to vector<16xf32>
    %151 = vector.shape_cast %150 : vector<16xf32> to vector<16x1xf32>
    %cst_51 = arith.constant 3.200000e+01 : f32
    %152 = vector.broadcast %cst_51 : f32 to vector<16x1xf32>
    %153 = arith.divf %151, %152 : vector<16x1xf32>
    %154 = vector.broadcast %153 : vector<16x1xf32> to vector<16x32xf32>
    %155 = arith.subf %147, %154 : vector<16x32xf32>
    %156 = arith.mulf %155, %155 : vector<16x32xf32>
    %cst_52 = arith.constant dense<0.000000e+00> : vector<16xf32>
    %157 = vector.multi_reduction <add>, %156, %cst_52 [1] : vector<16x32xf32> to vector<16xf32>
    %158 = vector.shape_cast %157 : vector<16xf32> to vector<16x1xf32>
    %cst_53 = arith.constant 3.200000e+01 : f32
    %159 = vector.broadcast %cst_53 : f32 to vector<16x1xf32>
    %160 = arith.divf %158, %159 : vector<16x1xf32>
    %cst_54 = arith.constant 9.99999974E-6 : f32
    %161 = vector.broadcast %cst_54 : f32 to vector<16x1xf32>
    %162 = arith.addf %160, %161 : vector<16x1xf32>
    %163 = math.rsqrt %162 : vector<16x1xf32>
    %164 = vector.broadcast %163 : vector<16x1xf32> to vector<16x32xf32>
    %165 = arith.mulf %155, %164 : vector<16x32xf32>
    %166 = vector.broadcast %148 : vector<1x32xf32> to vector<16x32xf32>
    %167 = arith.mulf %165, %166 : vector<16x32xf32>
    %168 = vector.broadcast %149 : vector<1x32xf32> to vector<16x32xf32>
    %169 = arith.addf %167, %168 : vector<16x32xf32>
    %c0_55 = arith.constant 0 : index
    %c0_56 = arith.constant 0 : index
    %170 = vector.load %arg4[%c0_55, %c0_56] : memref<32x64xf32, #tpu.memory_space<vmem>>, vector<32x64xf32>
    %cst_57 = arith.constant dense<0.000000e+00> : vector<16x64xf32>
    %171 = tpu.matmul %169, %170, %cst_57 {dimension_numbers = #tpu.dot_dimension_numbers<[1], [0], [0], [1], [0, 0, 1, 1], [], []>} : vector<16x32xf32>, vector<32x64xf32>, vector<16x64xf32> -> vector<16x64xf32>
    %c0_58 = arith.constant 0 : index
    %c0_59 = arith.constant 0 : index
    %172 = vector.load %arg5[%c0_58, %c0_59] : memref<1x64xf32, #tpu.memory_space<vmem>>, vector<1x64xf32>
    %173 = vector.broadcast %172 : vector<1x64xf32> to vector<16x64xf32>
    %174 = arith.addf %171, %173 : vector<16x64xf32>
    %cst_60 = arith.constant 0.000000e+00 : f32
    %175 = vector.broadcast %cst_60 : f32 to vector<16x64xf32>
    %176 = arith.maximumf %174, %175 : vector<16x64xf32>
    %c0_61 = arith.constant 0 : index
    %c0_62 = arith.constant 0 : index
    %177 = vector.load %arg6[%c0_61, %c0_62] : memref<64x32xf32, #tpu.memory_space<vmem>>, vector<64x32xf32>
    %cst_63 = arith.constant dense<0.000000e+00> : vector<16x32xf32>
    %178 = tpu.matmul %176, %177, %cst_63 {dimension_numbers = #tpu.dot_dimension_numbers<[1], [0], [0], [1], [0, 0, 1, 1], [], []>} : vector<16x64xf32>, vector<64x32xf32>, vector<16x32xf32> -> vector<16x32xf32>
    %c0_64 = arith.constant 0 : index
    %c0_65 = arith.constant 0 : index
    %179 = vector.load %arg7[%c0_64, %c0_65] : memref<1x32xf32, #tpu.memory_space<vmem>>, vector<1x32xf32>
    %180 = vector.broadcast %179 : vector<1x32xf32> to vector<16x32xf32>
    %181 = arith.addf %178, %180 : vector<16x32xf32>
    %182 = arith.addf %169, %181 : vector<16x32xf32>
    %c0_66 = arith.constant 0 : index
    %c0_67 = arith.constant 0 : index
    %183 = vector.load %arg10[%c0_66, %c0_67] : memref<1x32xf32, #tpu.memory_space<vmem>>, vector<1x32xf32>
    %c0_68 = arith.constant 0 : index
    %c0_69 = arith.constant 0 : index
    %184 = vector.load %arg11[%c0_68, %c0_69] : memref<1x32xf32, #tpu.memory_space<vmem>>, vector<1x32xf32>
    %cst_70 = arith.constant dense<0.000000e+00> : vector<16xf32>
    %185 = vector.multi_reduction <add>, %182, %cst_70 [1] : vector<16x32xf32> to vector<16xf32>
    %186 = vector.shape_cast %185 : vector<16xf32> to vector<16x1xf32>
    %cst_71 = arith.constant 3.200000e+01 : f32
    %187 = vector.broadcast %cst_71 : f32 to vector<16x1xf32>
    %188 = arith.divf %186, %187 : vector<16x1xf32>
    %189 = vector.broadcast %188 : vector<16x1xf32> to vector<16x32xf32>
    %190 = arith.subf %182, %189 : vector<16x32xf32>
    %191 = arith.mulf %190, %190 : vector<16x32xf32>
    %cst_72 = arith.constant dense<0.000000e+00> : vector<16xf32>
    %192 = vector.multi_reduction <add>, %191, %cst_72 [1] : vector<16x32xf32> to vector<16xf32>
    %193 = vector.shape_cast %192 : vector<16xf32> to vector<16x1xf32>
    %cst_73 = arith.constant 3.200000e+01 : f32
    %194 = vector.broadcast %cst_73 : f32 to vector<16x1xf32>
    %195 = arith.divf %193, %194 : vector<16x1xf32>
    %cst_74 = arith.constant 9.99999974E-6 : f32
    %196 = vector.broadcast %cst_74 : f32 to vector<16x1xf32>
    %197 = arith.addf %195, %196 : vector<16x1xf32>
    %198 = math.rsqrt %197 : vector<16x1xf32>
    %199 = vector.broadcast %198 : vector<16x1xf32> to vector<16x32xf32>
    %200 = arith.mulf %190, %199 : vector<16x32xf32>
    %201 = vector.broadcast %183 : vector<1x32xf32> to vector<16x32xf32>
    %202 = arith.mulf %200, %201 : vector<16x32xf32>
    %203 = vector.broadcast %184 : vector<1x32xf32> to vector<16x32xf32>
    %204 = arith.addf %202, %203 : vector<16x32xf32>
    %c0_75 = arith.constant 0 : index
    %c0_76 = arith.constant 0 : index
    %205 = vector.load %arg12[%c0_75, %c0_76] : memref<16x32xf32, #tpu.memory_space<vmem>>, vector<16x32xf32>
    tpu.vector_store %arg12[%c0_75, %c0_76], %204 {strides = array<i32>} : memref<16x32xf32, #tpu.memory_space<vmem>>, vector<16x32xf32>,
    return
  }
  func.func @transform_0(%arg0: i32) -> (i32, i32) {
    %c0_i32 = arith.constant 0 : i32
    %c0_i32_0 = arith.constant 0 : i32
    return %arg0, %c0_i32 : i32, i32
  }
  func.func @transform_1(%arg0: i32) -> (i32, i32) {
    %c0_i32 = arith.constant 0 : i32
    %c0_i32_0 = arith.constant 0 : i32
    %c0_i32_1 = arith.constant 0 : i32
    return %c0_i32, %c0_i32_0 : i32, i32
  }
  func.func @transform_2(%arg0: i32) -> (i32, i32) {
    %c0_i32 = arith.constant 0 : i32
    %c0_i32_0 = arith.constant 0 : i32
    %c0_i32_1 = arith.constant 0 : i32
    return %c0_i32, %c0_i32_0 : i32, i32
  }
  func.func @transform_3(%arg0: i32) -> (i32, i32) {
    %c0_i32 = arith.constant 0 : i32
    %c0_i32_0 = arith.constant 0 : i32
    %c0_i32_1 = arith.constant 0 : i32
    return %c0_i32, %c0_i32_0 : i32, i32
  }
  func.func @transform_4(%arg0: i32) -> (i32, i32) {
    %c0_i32 = arith.constant 0 : i32
    %c0_i32_0 = arith.constant 0 : i32
    %c0_i32_1 = arith.constant 0 : i32
    return %c0_i32, %c0_i32_0 : i32, i32
  }
  func.func @transform_5(%arg0: i32) -> (i32, i32) {
    %c0_i32 = arith.constant 0 : i32
    %c0_i32_0 = arith.constant 0 : i32
    %c0_i32_1 = arith.constant 0 : i32
    return %c0_i32, %c0_i32_0 : i32, i32
  }
  func.func @transform_6(%arg0: i32) -> (i32, i32) {
    %c0_i32 = arith.constant 0 : i32
    %c0_i32_0 = arith.constant 0 : i32
    %c0_i32_1 = arith.constant 0 : i32
    return %c0_i32, %c0_i32_0 : i32, i32
  }
  func.func @transform_7(%arg0: i32) -> (i32, i32) {
    %c0_i32 = arith.constant 0 : i32
    %c0_i32_0 = arith.constant 0 : i32
    %c0_i32_1 = arith.constant 0 : i32
    return %c0_i32, %c0_i32_0 : i32, i32
  }
  func.func @transform_8(%arg0: i32) -> (i32, i32) {
    %c0_i32 = arith.constant 0 : i32
    %c0_i32_0 = arith.constant 0 : i32
    %c0_i32_1 = arith.constant 0 : i32
    return %c0_i32, %c0_i32_0 : i32, i32
  }
  func.func @transform_9(%arg0: i32) -> (i32, i32) {
    %c0_i32 = arith.constant 0 : i32
    %c0_i32_0 = arith.constant 0 : i32
    %c0_i32_1 = arith.constant 0 : i32
    return %c0_i32, %c0_i32_0 : i32, i32
  }
  func.func @transform_10(%arg0: i32) -> (i32, i32) {
    %c0_i32 = arith.constant 0 : i32
    %c0_i32_0 = arith.constant 0 : i32
    %c0_i32_1 = arith.constant 0 : i32
    return %c0_i32, %c0_i32_0 : i32, i32
  }
  func.func @transform_11(%arg0: i32) -> (i32, i32) {
    %c0_i32 = arith.constant 0 : i32
    %c0_i32_0 = arith.constant 0 : i32
    return %arg0, %c0_i32 : i32, i32
  }
}

</mosaic_0001>

<bundles_post_ra>
// kernel: tpu_custom_call.1
= control target key start
LH: loop header
LB: loop body
LE: loop exit
PB: predicated region body
PF: predicated region fallthrough
CT: control target
= control target key end

     0   :  { %16 = vsyncpa [#allocation3], 0  ;;  %s1489_s0 = inlined_call_operand.hbm [shape: f32[16,32], index: 0, kind: input, shape index: {}]   ;;  %s1490_s1 = inlined_call_operand.vmem [shape: f32[32,96], index: 1, kind: input, shape index: {}]   ;;  %s1491_s2 = inlined_call_operand.vmem [shape: f32[32,32], index: 2, kind: input, shape index: {}]   ;;  %s1492_s3 = inlined_call_operand.vmem [shape: f32[32,64], index: 3, kind: input, shape index: {}]   ;;  %s1493_s4 = inlined_call_operand.vmem [shape: f32[1,64], index: 4, kind: input, shape index: {}]   ;;  %s1494_s5 = inlined_call_operand.vmem [shape: f32[64,32], index: 5, kind: input, shape index: {}]   ;;  %s1495_s6 = inlined_call_operand.vmem [shape: f32[1,32], index: 6, kind: input, shape index: {}]   ;;  %s1496_s7 = inlined_call_operand.vmem [shape: f32[1,32], index: 7, kind: input, shape index: {}]   ;;  %s1497_s8 = inlined_call_operand.vmem [shape: f32[1,32], index: 8, kind: input, shape index: {}]   ;;  %s1498_s9 = inlined_call_operand.vmem [shape: f32[1,32], index: 9, kind: input, shape index: {}]   ;;  %s1499_s10 = inlined_call_operand.vmem [shape: f32[1,32], index: 10, kind: input, shape index: {}]   ;;  %s1500_s11 = inlined_call_operand.hbm [shape: f32[16,32], index: 11, kind: output, shape index: {}]  }
   0x1   :  { %17 = vsyncpa [#allocation4], 0  ;;  %s22_s19 = sshll.u32 %s1489_s0, 4  ;;  %s1162_s20 = smov [#allocation2]   ;;  %s23_s19 = int_to_ptr.hbm [resolvable:$true] %s22_s19 }
   0x2   :  { %s24_s21 = sshll.u32 %s1162_s20, 4  ;;  %s1163_s22 = smov 128   ;;  %s25_s21 = int_to_ptr.vmem [resolvable:$true] %s24_s21 }
   0x3   :  { %s1164_s23 = smov 8  }
   0x4   :  { %30 = dma.hbm_to_vmem [thread:$0]  %s23_s19, 256, %s25_s21, [#allocation3], %s1163_s22, %s1163_s22, %s1164_s23  }
   0x5   :  { %1158 = dma.done.wait [#allocation3], 256  }
   0x6   :  { %1159 = vsyncadd [#allocation3], 4294967040  ;;  %v60_v0 = vld [vmem:[%s1490_s1 + $0x18] sm:$0xff]  ;;  %v59_v1 = vld [vmem:[%s1490_s1 + $0x10] sm:$0xff]  ;;  %vm61_vm0 = vcmask 261120   ;;  %s1165_s12 = smov 120  }
   0x7   :  { %80 = vmatpush.msra.mxu0 %v60_v0  ;;  %v58_v2 = vld [vmem:[%s1490_s1 + $0x8] sm:$0xff]  ;;  %v57_v3 = vld [vmem:[%s1490_s1] sm:$0xff]  ;;  %s1166_s13 = smov 96   ;;  %s1167_s14 = smov 64   ;;  %vm94_vm1 = vcmask 64512  }
   0x8   :  { %v1258_v4 = vld [vmem:[#allocation2] sm:$0xff]  ;;  %s1168_s1 = smov 80   ;;  %s1169_s15 = smov 112   ;;  %v1288_v35 = vld [vmem:[#allocation2 + $0x8] sm:$0xff] }
   0x9   :  { %81 = vmatpush.msra.mxu0 %v59_v1  ;;  %s1170_s16 = smov 88   ;;  %s1171_s17 = smov 48  }
   0xa   :  { %s1172_s18 = smov 72   ;;  %s1173_s19 = smov 56  }
   0xb   :  { %82 = vmatpush.msra.mxu0 %v58_v2  ;;  %s1174_s20 = smov 104   ;;  %s1175_s21 = smov 40  }
   0xc   :  { %s1176_s24 = smov 16   ;;  %s1177_s25 = smov 24  }
   0xd   :  { %83 = vmatpush.msra.mxu0 %v57_v3 }
   0xe   :  { %1012 = vmatmul.msk.f32.vlgmr.msra.gmra.mxu0 %vm61_vm0, %v1258_v4 }
  0x16   :  { %1013 = vmatmul.msk.f32.gmra.mxu0 %vm61_vm0, %v1288_v35 }
  0x8b   :  { %v1262_v5 = vpop.f32.mrf.mxu0 }
  0x8c   :  { %170 = vrot.lane.b32.xlu2 %v1262_v5, %s1165_s12  ;;  %92 = vrot.lane.b32.xlu0 %v1262_v5, %s1166_s13 }
  0x93   :  { %v1297_v43 = vpop.f32.mrf.mxu0 }
  0x94   :  { %144 = vrot.lane.b32.xlu2 %v1262_v5, %s1167_s14 }
  0x9c   :  { %251 = vrot.lane.b32.xlu2 %v1262_v5, %s1168_s1 }
  0xa4   :  { %249 = vrot.lane.b32.xlu2 %v1262_v5, %s1169_s15 }
  0xe6   :  { %v171_v6 = vpop.permute.xlu2 %170 }
  0xee   :  { %v145_v7 = vpop.permute.xlu2 %144 }
  0xf6   :  { %v252_v9 = vpop.permute.xlu2 %251 }
  0xfe   :  { %v93_v8 = vpop.permute.xlu0 %92  ;;  %v250_v31 = vpop.permute.xlu2 %249 }
  0xff   :  { %1014 = vmatpush.xpose.msk.msra.mxu1 %vm94_vm1, %v93_v8 }
 0x102   :  { %1015 = vmatmul.msk.f32.vlgmr.msra.gmra.mxu1 %vm94_vm1, %v1262_v5 }
 0x103   :  { %165 = vmatpush.msrb.mxu1 %v145_v7 }
 0x105   :  { %1020 = vmatpush.xpose.msk.msra.mxu1 %vm94_vm1, %v252_v9 }
 0x17f   :  { %v116_v10 = vpop.f32.mrf.mxu1 }
 0x180   :  { %v119_v11 = vmul.f32 0.35355338, %v116_v10 }
 0x182   :  { %v120_v12 = vsel %vm94_vm1, %v119_v11, -inf }
 0x183   :  { %121 = vmax.xlane.f32.xlu0 %v120_v12 }
 0x1f6   :  { %v122_v13 = vpop.xlane.xlu0 %121 }
 0x1f7   :  { %v123_v14 = vsub.f32 %v119_v11, %v122_v13 }
 0x1f9   :  { %v124_v15 = vmul.f32 1.442695, %v123_v14 }
 0x1fb   :  { %1068 = vpow2.f32 %v124_v15 }
 0x201   :  { %v1069_v16 = vpop.eup %1068 }
 0x202   :  { %v126_v17 = vsel %vm94_vm1, %v1069_v16, 0.0 }
 0x203   :  { %127 = vadd.xlane.f32.xlu1 %v126_v17 }
 0x21c   :  { %172 = vrot.lane.b32.xlu1 %v1262_v5, %s1170_s16 }
 0x276   :  { %v128_v18 = vpop.xlane.xlu1 %127 }
 0x277   :  { %1070 = vrcp.f32 %v128_v18  ;;  %v140_v22 = vand.u32 2147483648, %v128_v18  ;;  %v138_v24 = vand.u32 2147483647, %v128_v18  ;;  %vm134_vm3 = vweird.f32 %v128_v18 }
 0x279   :  { %v141_v26 = vor.u32 1.1754944e-38, %v140_v22  ;;  %vm139_vm5 = vcmp.eq.f32.partialorder %v138_v24, 8.507059e+37 }
 0x27d   :  { %v1071_v19 = vpop.eup %1070 }
 0x27e   :  { %v130_v20 = vmul.f32 %v1071_v19, %v128_v18  ;;  %vm135_vm2 = vweird.f32 %v1071_v19 }
 0x27f   :  { %vm136_vm4 = vmor %vm134_vm3, %vm135_vm2 }
 0x280   :  { %v131_v21 = vsub.f32 1.0, %v130_v20 }
 0x282   :  { %v132_v23 = vmul.f32 %v1071_v19, %v131_v21 }
 0x284   :  { %v133_v25 = vadd.f32 %v1071_v19, %v132_v23 }
 0x286   :  { %v137_v27 = vsel %vm136_vm4, %v1071_v19, %v133_v25 }
 0x287   :  { %v142_v28 = vsel %vm139_vm5, %v141_v26, %v137_v27 }
 0x288   :  { %v143_v29 = vmul.f32 %v1069_v16, %v142_v28 }
 0x28a   :  { %1016 = vmatmul.msk.f32.vlgmr.msrb.gmra.mxu1 %vm94_vm1, %v143_v29 }
 0x28e   :  { %v173_v30 = vpop.permute.xlu1 %172 }
 0x28f   :  { %1017 = vmatpush.xpose.msk.msra.mxu3 %vm94_vm1, %v173_v30 }
 0x292   :  { %1018 = vmatmul.msk.f32.vlgmr.msra.gmra.mxu3 %vm94_vm1, %v171_v6  ;;  %1021 = vmatmul.msk.f32.vlgmr.msra.gmra.mxu1 %vm94_vm1, %v250_v31 }
 0x307   :  { %v1286_v32 = vpop.f32.mrf.mxu1 }
 0x30f   :  { %v274_v33 = vpop.f32.mrf.mxu1 }
 0x310   :  { %v277_v34 = vmul.f32 0.35355338, %v274_v33 }
 0x312   :  { %v278_v36 = vsel %vm94_vm1, %v277_v34, -inf }
 0x313   :  { %279 = vmax.xlane.f32.xlu1 %v278_v36 }
 0x315   :  { %v195_v37 = vpop.f32.mrf.mxu3 }
 0x316   :  { %v198_v38 = vmul.f32 0.35355338, %v195_v37 }
 0x318   :  { %v199_v39 = vsel %vm94_vm1, %v198_v38, -inf }
 0x319   :  { %200 = vmax.xlane.f32.xlu2 %v199_v39 }
 0x32c   :  { %302 = vrot.lane.b32.xlu1 %v1262_v5, %s1171_s17 }
 0x331   :  { %330 = vrot.lane.b32.xlu2 %v1262_v5, %s1172_s18 }
 0x334   :  { %502 = vrot.lane.b32.xlu1 %v1297_v43, %s1165_s12 }
 0x339   :  { %504 = vrot.lane.b32.xlu2 %v1297_v43, %s1170_s16 }
 0x33c   :  { %581 = vrot.lane.b32.xlu1 %v1297_v43, %s1169_s15 }
 0x341   :  { %662 = vrot.lane.b32.xlu2 %v1297_v43, %s1172_s18 }
 0x386   :  { %v280_v44 = vpop.xlane.xlu1 %279 }
 0x387   :  { %v281_v48 = vsub.f32 %v277_v34, %v280_v44 }
 0x389   :  { %v282_v49 = vmul.f32 1.442695, %v281_v48 }
 0x38c   :  { %v201_v40 = vpop.xlane.xlu2 %200 }
 0x38d   :  { %v202_v41 = vsub.f32 %v198_v38, %v201_v40 }
 0x38f   :  { %v203_v42 = vmul.f32 1.442695, %v202_v41 }
 0x391   :  { %1072 = vpow2.f32 %v203_v42 }
 0x392   :  { %1074 = vpow2.f32 %v282_v49 }
 0x394   :  { %v331_v56 = vpop.permute.xlu2 %330 }
 0x397   :  { %v1073_v45 = vpop.eup %1072 }
 0x398   :  { %v205_v46 = vsel %vm94_vm1, %v1073_v45, 0.0  ;;  %v1075_v50 = vpop.eup %1074 }
 0x399   :  { %206 = vadd.xlane.f32.xlu0 %v205_v46  ;;  %v284_v51 = vsel %vm94_vm1, %v1075_v50, 0.0 }
 0x39c   :  { %v505_v1 = vpop.permute.xlu2 %504 }
 0x39e   :  { %v303_v47 = vpop.permute.xlu1 %302 }
 0x39f   :  { %323 = vmatpush.msrb.mxu3 %v303_v47 }
 0x3a4   :  { %v663_v6 = vpop.permute.xlu2 %662 }
 0x3a6   :  { %v503_v8 = vpop.permute.xlu1 %502 }
 0x3ad   :  { %223 = vrot.lane.b32.xlu0 %v1262_v5, %s1173_s19 }
 0x3ae   :  { %v582_v23 = vpop.permute.xlu1 %581 }
 0x3b5   :  { %328 = vrot.lane.b32.xlu0 %v1262_v5, %s1174_s20 }
 0x3bd   :  { %425 = vrot.lane.b32.xlu0 %v1297_v43, %s1166_s13 }
 0x3c5   :  { %583 = vrot.lane.b32.xlu0 %v1297_v43, %s1168_s1 }
 0x3ef   :  { %285 = vadd.xlane.f32.xlu0 %v284_v51 }
 0x403   :  { %660 = vrot.lane.b32.xlu0 %v1297_v43, %s1174_s20 }
 0x40c   :  { %v207_v52 = vpop.xlane.xlu0 %206 }
 0x40d   :  { %1076 = vrcp.f32 %v207_v52  ;;  %v219_v57 = vand.u32 2147483648, %v207_v52  ;;  %v217_v59 = vand.u32 2147483647, %v207_v52  ;;  %vm213_vm7 = vweird.f32 %v207_v52 }
 0x40f   :  { %v220_v61 = vor.u32 1.1754944e-38, %v219_v57  ;;  %vm218_vm9 = vcmp.eq.f32.partialorder %v217_v59, 8.507059e+37 }
 0x413   :  { %v1077_v53 = vpop.eup %1076 }
 0x414   :  { %v209_v54 = vmul.f32 %v1077_v53, %v207_v52  ;;  %vm214_vm6 = vweird.f32 %v1077_v53 }
 0x415   :  { %vm215_vm8 = vmor %vm213_vm7, %vm214_vm6 }
 0x416   :  { %v210_v55 = vsub.f32 1.0, %v209_v54 }
 0x418   :  { %v211_v58 = vmul.f32 %v1077_v53, %v210_v55 }
 0x41a   :  { %v212_v60 = vadd.f32 %v1077_v53, %v211_v58 }
 0x41c   :  { %v216_v62 = vsel %vm215_vm8, %v1077_v53, %v212_v60 }
 0x41d   :  { %v221_v63 = vsel %vm218_vm9, %v220_v61, %v216_v62 }
 0x41e   :  { %v222_v0 = vmul.f32 %v1073_v45, %v221_v63 }
 0x41f   :  { %v224_v2 = vpop.permute.xlu0 %223 }
 0x420   :  { %244 = vmatpush.msra.mxu2 %v224_v2 }
 0x421   :  { %1019 = vmatmul.msk.f32.vlgmr.msra.gmra.mxu2 %vm94_vm1, %v222_v0 }
 0x422   :  { %1023 = vmatpush.xpose.msk.msrb.mxu2 %vm94_vm1, %v331_v56 }
 0x426   :  { %1029 = vmatpush.xpose.msk.msra.mxu2 %vm94_vm1, %v505_v1 }
 0x427   :  { %v329_v3 = vpop.permute.xlu0 %328 }
 0x429   :  { %1024 = vmatmul.msk.f32.vlgmr.msrb.gmra.mxu2 %vm94_vm1, %v329_v3 }
 0x42a   :  { %1035 = vmatpush.xpose.msk.msrb.mxu2 %vm94_vm1, %v663_v6 }
 0x42f   :  { %v426_v7 = vpop.permute.xlu0 %425 }
 0x430   :  { %1026 = vmatpush.xpose.msk.msra.mxu3 %vm94_vm1, %v426_v7 }
 0x431   :  { %1030 = vmatmul.msk.f32.vlgmr.msra.gmra.mxu2 %vm94_vm1, %v503_v8 }
 0x437   :  { %v584_v9 = vpop.permute.xlu0 %583 }
 0x462   :  { %v286_v10 = vpop.xlane.xlu0 %285 }
 0x463   :  { %1078 = vrcp.f32 %v286_v10  ;;  %v298_v14 = vand.u32 2147483648, %v286_v10  ;;  %v296_v16 = vand.u32 2147483647, %v286_v10  ;;  %vm292_vm11 = vweird.f32 %v286_v10 }
 0x465   :  { %v299_v18 = vor.u32 1.1754944e-38, %v298_v14  ;;  %vm297_vm13 = vcmp.eq.f32.partialorder %v296_v16, 8.507059e+37 }
 0x469   :  { %v1079_v11 = vpop.eup %1078 }
 0x46a   :  { %v288_v12 = vmul.f32 %v1079_v11, %v286_v10  ;;  %vm293_vm10 = vweird.f32 %v1079_v11 }
 0x46b   :  { %vm294_vm12 = vmor %vm292_vm11, %vm293_vm10 }
 0x46c   :  { %v289_v13 = vsub.f32 1.0, %v288_v12 }
 0x46e   :  { %v290_v15 = vmul.f32 %v1079_v11, %v289_v13 }
 0x470   :  { %v291_v17 = vadd.f32 %v1079_v11, %v290_v15 }
 0x472   :  { %v295_v19 = vsel %vm294_vm12, %v1079_v11, %v291_v17 }
 0x473   :  { %v300_v20 = vsel %vm297_vm13, %v299_v18, %v295_v19 }
 0x474   :  { %v301_v21 = vmul.f32 %v1075_v50, %v300_v20 }
 0x475   :  { %v661_v22 = vpop.permute.xlu0 %660 }
 0x476   :  { %1022 = vmatmul.msk.f32.vlgmr.msrb.gmra.mxu3 %vm94_vm1, %v301_v21  ;;  %1036 = vmatmul.msk.f32.vlgmr.msrb.gmra.mxu2 %vm94_vm1, %v661_v22 }
 0x477   :  { %1032 = vmatpush.xpose.msk.msrb.mxu3 %vm94_vm1, %v584_v9 }
 0x47e   :  { %1027 = vmatmul.msk.f32.vlgmr.msra.gmra.mxu3 %vm94_vm1, %v1297_v43 }
 0x486   :  { %1033 = vmatmul.msk.f32.vlgmr.msrb.gmra.mxu3 %vm94_vm1, %v582_v23 }
 0x4a4   :  { %v1329_v24 = vpop.f32.mrf.mxu2 }
 0x4ac   :  { %v353_v25 = vpop.f32.mrf.mxu2 }
 0x4ad   :  { %v356_v26 = vmul.f32 0.35355338, %v353_v25 }
 0x4af   :  { %v357_v27 = vsel %vm94_vm1, %v356_v26, -inf }
 0x4b0   :  { %358 = vmax.xlane.f32.xlu2 %v357_v27 }
 0x4b4   :  { %v527_v28 = vpop.f32.mrf.mxu2 }
 0x4b5   :  { %v530_v29 = vmul.f32 0.35355338, %v527_v28 }
 0x4b7   :  { %v531_v30 = vsel %vm94_vm1, %v530_v29, -inf }
 0x4b8   :  { %532 = vmax.xlane.f32.xlu0 %v531_v30 }
 0x4f9   :  { %v325_v31 = vpop.f32.mrf.mxu3  ;;  %v685_v37 = vpop.f32.mrf.mxu2 }
 0x4fa   :  { %v688_v38 = vmul.f32 0.35355338, %v685_v37 }
 0x4fc   :  { %v689_v42 = vsel %vm94_vm1, %v688_v38, -inf }
 0x501   :  { %v448_v33 = vpop.f32.mrf.mxu3 }
 0x502   :  { %v451_v34 = vmul.f32 0.35355338, %v448_v33 }
 0x504   :  { %v452_v36 = vsel %vm94_vm1, %v451_v34, -inf }
 0x505   :  { %453 = vmax.xlane.f32.xlu1 %v452_v36 }
 0x509   :  { %v606_v39 = vpop.f32.mrf.mxu3 }
 0x50a   :  { %v609_v40 = vmul.f32 0.35355338, %v606_v39 }
 0x50c   :  { %v610_v41 = vsel %vm94_vm1, %v609_v40, -inf }
 0x50d   :  { %611 = vmax.xlane.f32.xlu2 %v610_v41  ;;  %690 = vmax.xlane.f32.xlu1 %v689_v42 }
 0x523   :  { %v359_v44 = vpop.xlane.xlu2 %358 }
 0x524   :  { %v360_v45 = vsub.f32 %v356_v26, %v359_v44 }
 0x526   :  { %v361_v46 = vmul.f32 1.442695, %v360_v45 }
 0x528   :  { %1080 = vpow2.f32 %v361_v46 }
 0x52b   :  { %v533_v47 = vpop.xlane.xlu0 %532 }
 0x52c   :  { %v534_v48 = vsub.f32 %v530_v29, %v533_v47 }
 0x52e   :  { %v1081_v49 = vpop.eup %1080  ;;  %v535_v50 = vmul.f32 1.442695, %v534_v48 }
 0x52f   :  { %v363_v51 = vsel %vm94_vm1, %v1081_v49, 0.0 }
 0x530   :  { %1082 = vpow2.f32 %v535_v50  ;;  %364 = vadd.xlane.f32.xlu0 %v363_v51 }
 0x536   :  { %v1337_v52 = vpop.eup %1082 }
 0x537   :  { %v537_v53 = vsel %vm94_vm1, %v1337_v52, 0.0 }
 0x538   :  { %538 = vadd.xlane.f32.xlu1 %v537_v53 }
 0x544   :  { %476 = vrot.lane.b32.xlu0 %v1297_v43, %s1167_s14 }
 0x551   :  { %381 = vrot.lane.b32.xlu1 %v1262_v5, %s1175_s21 }
 0x559   :  { %713 = vrot.lane.b32.xlu1 %v1297_v43, %s1175_s21 }
 0x578   :  { %v454_v54 = vpop.xlane.xlu1 %453 }
 0x579   :  { %v455_v61 = vsub.f32 %v451_v34, %v454_v54 }
 0x57b   :  { %v456_v62 = vmul.f32 1.442695, %v455_v61 }
 0x580   :  { %v612_v55 = vpop.xlane.xlu2 %611  ;;  %v691_v56 = vpop.xlane.xlu1 %690 }
 0x581   :  { %v613_v57 = vsub.f32 %v609_v40, %v612_v55  ;;  %v692_v58 = vsub.f32 %v688_v38, %v691_v56 }
 0x583   :  { %v614_v59 = vmul.f32 1.442695, %v613_v57  ;;  %v693_v60 = vmul.f32 1.442695, %v692_v58 }
 0x585   :  { %1084 = vpow2.f32 %v614_v59 }
 0x586   :  { %1086 = vpow2.f32 %v693_v60 }
 0x587   :  { %1088 = vpow2.f32 %v456_v62 }
 0x58b   :  { %v1345_v63 = vpop.eup %1084 }
 0x58c   :  { %v1347_v0 = vpop.eup %1086  ;;  %v616_v5 = vsel %vm94_vm1, %v1345_v63, 0.0 }
 0x58d   :  { %617 = vadd.xlane.f32.xlu0 %v616_v5  ;;  %v695_v1 = vsel %vm94_vm1, %v1347_v0, 0.0  ;;  %v1353_v2 = vpop.eup %1088 }
 0x58e   :  { %696 = vadd.xlane.f32.xlu2 %v695_v1  ;;  %v458_v3 = vsel %vm94_vm1, %v1353_v2, 0.0 }
 0x596   :  { %459 = vadd.xlane.f32.xlu2 %v458_v3 }
 0x5a1   :  { %634 = vrot.lane.b32.xlu0 %v1297_v43, %s1171_s17 }
 0x5a3   :  { %v365_v6 = vpop.xlane.xlu0 %364 }
 0x5a4   :  { %1090 = vrcp.f32 %v365_v6  ;;  %v377_v13 = vand.u32 2147483648, %v365_v6  ;;  %vm371_vm15 = vweird.f32 %v365_v6  ;;  %v375_v14 = vand.u32 2147483647, %v365_v6 }
 0x5a6   :  { %v378_v17 = vor.u32 1.1754944e-38, %v377_v13  ;;  %vm376_vm3 = vcmp.eq.f32.partialorder %v375_v14, 8.507059e+37  ;;  %v757_v14 = vld [vmem:[%s1491_s2 + $0x18] sm:$0xff] }
 0x5a7   :  { %776 = vmatpush.msra.mxu3 %v757_v14  ;;  %v896_v14 = vld [vmem:[%s1494_s5 + $0x28] sm:$0xff] }
 0x5a9   :  { %412 = vrot.lane.b32.xlu0 %v325_v31, %s1176_s24 }
 0x5aa   :  { %v1091_v7 = vpop.eup %1090 }
 0x5ab   :  { %v367_v8 = vmul.f32 %v1091_v7, %v365_v6  ;;  %vm372_vm14 = vweird.f32 %v1091_v7  ;;  %v539_v15 = vpop.xlane.xlu1 %538 }
 0x5ac   :  { %vm373_vm2 = vmor %vm371_vm15, %vm372_vm14  ;;  %1092 = vrcp.f32 %v539_v15  ;;  %v551_v28 = vand.u32 2147483648, %v539_v15  ;;  %vm545_vm5 = vweird.f32 %v539_v15  ;;  %v549_v29 = vand.u32 2147483647, %v539_v15 }
 0x5ad   :  { %v368_v9 = vsub.f32 1.0, %v367_v8 }
 0x5ae   :  { %555 = vrot.lane.b32.xlu2 %v1297_v43, %s1173_s19  ;;  %v552_v37 = vor.u32 1.1754944e-38, %v551_v28  ;;  %vm550_vm7 = vcmp.eq.f32.partialorder %v549_v29, 8.507059e+37 }
 0x5af   :  { %v369_v10 = vmul.f32 %v1091_v7, %v368_v9 }
 0x5b1   :  { %v370_v12 = vadd.f32 %v1091_v7, %v369_v10 }
 0x5b2   :  { %v1093_v20 = vpop.eup %1092 }
 0x5b3   :  { %v374_v16 = vsel %vm373_vm2, %v1091_v7, %v370_v12  ;;  %v541_v21 = vmul.f32 %v1093_v20, %v539_v15  ;;  %vm546_vm4 = vweird.f32 %v1093_v20  ;;  %v755_v15 = vld [vmem:[%s1491_s2 + $0x8] sm:$0xff] }
 0x5b4   :  { %v379_v18 = vsel %vm376_vm3, %v378_v17, %v374_v16  ;;  %vm547_vm6 = vmor %vm545_vm5, %vm546_vm4  ;;  %v754_v16 = vld [vmem:[%s1491_s2] sm:$0xff] }
 0x5b5   :  { %v380_v43 = vmul.f32 %v1081_v49, %v379_v18  ;;  %v542_v22 = vsub.f32 1.0, %v541_v21 }
 0x5b6   :  { %408 = vrot.lane.b32.xlu2 %v1329_v24, %s1164_s23  ;;  %v477_v11 = vpop.permute.xlu0 %476 }
 0x5b7   :  { %497 = vmatpush.msrb.mxu0 %v477_v11  ;;  %v543_v25 = vmul.f32 %v1093_v20, %v542_v22 }
 0x5b9   :  { %v544_v26 = vadd.f32 %v1093_v20, %v543_v25 }
 0x5bb   :  { %v548_v34 = vsel %vm547_vm6, %v1093_v20, %v544_v26  ;;  %vm420_vm6 = vcmask 130048  }
 0x5bc   :  { %v553_v40 = vsel %vm550_vm7, %v552_v37, %v548_v34  ;;  %vm422_vm7 = vcmask 195584  }
 0x5bd   :  { %v554_v49 = vmul.f32 %v1337_v52, %v553_v40 }
 0x5c3   :  { %v382_v19 = vpop.permute.xlu1 %381 }
 0x5c4   :  { %402 = vmatpush.msrb.mxu1 %v382_v19 }
 0x5c5   :  { %1025 = vmatmul.msk.f32.vlgmr.msrb.gmra.mxu1 %vm94_vm1, %v380_v43 }
 0x5cb   :  { %v714_v51 = vpop.permute.xlu1 %713 }
 0x600   :  { %v1365_v24 = vpop.xlane.xlu0 %617 }
 0x601   :  { %v697_v23 = vpop.xlane.xlu2 %696  ;;  %v630_v6 = vand.u32 2147483648, %v1365_v24  ;;  %vm624_vm3 = vweird.f32 %v1365_v24  ;;  %v628_v8 = vand.u32 2147483647, %v1365_v24 }
 0x602   :  { %1094 = vrcp.f32 %v697_v23  ;;  %v707_v44 = vand.u32 2147483647, %v697_v23  ;;  %v709_v45 = vand.u32 2147483648, %v697_v23  ;;  %vm703_vm9 = vweird.f32 %v697_v23 }
 0x603   :  { %1096 = vrcp.f32 %v1365_v24  ;;  %v631_v11 = vor.u32 1.1754944e-38, %v630_v6  ;;  %vm629_vm5 = vcmp.eq.f32.partialorder %v628_v8, 8.507059e+37 }
 0x604   :  { %vm708_vm11 = vcmp.eq.f32.partialorder %v707_v44, 8.507059e+37  ;;  %v710_v56 = vor.u32 1.1754944e-38, %v709_v45 }
 0x608   :  { %v1095_v27 = vpop.eup %1094 }
 0x609   :  { %v699_v30 = vmul.f32 %v1095_v27, %v697_v23  ;;  %v460_v31 = vpop.xlane.xlu2 %459  ;;  %v1097_v33 = vpop.eup %1096  ;;  %vm704_vm8 = vweird.f32 %v1095_v27 }
 0x60a   :  { %1098 = vrcp.f32 %v460_v31  ;;  %v620_v39 = vmul.f32 %v1097_v33, %v1365_v24  ;;  %vm1370_vm10 = vmor %vm703_vm9, %vm704_vm8  ;;  %v472_v57 = vand.u32 2147483648, %v460_v31  ;;  %v470_v59 = vand.u32 2147483647, %v460_v31 }
 0x60b   :  { %v700_v36 = vsub.f32 1.0, %v699_v30  ;;  %vm466_vm13 = vweird.f32 %v460_v31  ;;  %vm625_vm14 = vweird.f32 %v1097_v33 }
 0x60c   :  { %v621_v46 = vsub.f32 1.0, %v620_v39  ;;  %v473_v62 = vor.u32 1.1754944e-38, %v472_v57  ;;  %vm471_vm2 = vcmp.eq.f32.partialorder %v470_v59, 8.507059e+37  ;;  %vm626_vm4 = vmor %vm624_vm3, %vm625_vm14  ;;  %v853_v57 = vld [vmem:[%s1492_s3 + $0x8] sm:$0xff]  ;;  %vm903_vm14 = vcmask 523264  }
 0x60d   :  { %v701_v38 = vmul.f32 %v1095_v27, %v700_v36 }
 0x60e   :  { %v622_v58 = vmul.f32 %v1097_v33, %v621_v46 }
 0x60f   :  { %v702_v41 = vadd.f32 %v1095_v27, %v701_v38 }
 0x610   :  { %v1099_v42 = vpop.eup %1098  ;;  %v623_v5 = vadd.f32 %v1097_v33, %v622_v58  ;;  %v852_v58 = vld [vmem:[%s1492_s3] sm:$0xff] }
 0x611   :  { %v462_v47 = vmul.f32 %v1099_v42, %v460_v31  ;;  %v556_v48 = vpop.permute.xlu2 %555  ;;  %v706_v53 = vsel %vm1370_vm10, %v1095_v27, %v702_v41  ;;  %vm467_vm12 = vweird.f32 %v1099_v42 }
 0x612   :  { %576 = vmatpush.msra.mxu1 %v556_v48  ;;  %v711_v60 = vsel %vm708_vm11, %v710_v56, %v706_v53  ;;  %vm468_vm15 = vmor %vm466_vm13, %vm467_vm12  ;;  %v627_v10 = vsel %vm626_vm4, %v1097_v33, %v623_v5  ;;  %v854_v56 = vld [vmem:[%s1492_s3 + $0x10] sm:$0xff] }
 0x613   :  { %v463_v54 = vsub.f32 1.0, %v462_v47  ;;  %1031 = vmatmul.msk.f32.vlgmr.msra.gmra.mxu1 %vm94_vm1, %v554_v49  ;;  %v635_v55 = vpop.permute.xlu0 %634  ;;  %v712_v1 = vmul.f32 %v1347_v0, %v711_v60  ;;  %v632_v12 = vsel %vm629_vm5, %v631_v11, %v627_v10  ;;  %v1063_v10 = vld [vmem:[%s1497_s8] ss:$0 sm:$0xff] }
 0x614   :  { %734 = vmatpush.msrb.mxu1 %v714_v51  ;;  %655 = vmatpush.msra.mxu0 %v635_v55  ;;  %v633_v0 = vmul.f32 %v1345_v63, %v632_v12  ;;  %v855_v55 = vld [vmem:[%s1492_s3 + $0x18] sm:$0xff] }
 0x615   :  { %v464_v52 = vmul.f32 %v1099_v42, %v463_v54 }
 0x617   :  { %v465_v61 = vadd.f32 %v1099_v42, %v464_v52 }
 0x619   :  { %v469_v3 = vsel %vm468_vm15, %v1099_v42, %v465_v61  ;;  %v409_v43 = vpop.permute.xlu2 %408 }
 0x61a   :  { %v474_v7 = vsel %vm471_vm2, %v473_v62, %v469_v3  ;;  %v419_v21 = vsel %vm94_vm1, %v1286_v32, %v409_v43  ;;  %v1178_v32 = vmov 32.0  }
 0x61b   :  { %1037 = vmatmul.msk.f32.vlgmr.msrb.gmra.mxu1 %vm94_vm1, %v712_v1  ;;  %v475_v9 = vmul.f32 %v1353_v2, %v474_v7  ;;  %v756_v2 = vld [vmem:[%s1491_s2 + $0x10] sm:$0xff]  ;;  %v413_v20 = vpop.permute.xlu0 %412  ;;  %1100 = vrcp.f32 %v1178_v32  ;;  %v1062_v7 = vld [vmem:[%s1496_s7] ss:$0 sm:$0xff] }
 0x61c   :  { %777 = vmatpush.msra.mxu3 %v756_v2  ;;  %v421_v22 = vsel %vm420_vm6, %v419_v21, %v413_v20 }
 0x61d   :  { %1028 = vmatmul.msk.f32.vlgmr.msrb.gmra.mxu0 %vm94_vm1, %v475_v9 }
 0x61e   :  { %778 = vmatpush.msra.mxu3 %v755_v15  ;;  %878 = vmatpush.msrb.mxu0 %v855_v55 }
 0x620   :  { %779 = vmatpush.msra.mxu3 %v754_v16  ;;  %879 = vmatpush.msrb.mxu0 %v854_v56 }
 0x621   :  { %v1101_v37 = vpop.eup %1100 }
 0x622   :  { %v798_v40 = vmul.f32 32.0, %v1101_v37  ;;  %880 = vmatpush.msrb.mxu0 %v853_v57 }
 0x624   :  { %v799_v41 = vsub.f32 1.0, %v798_v40  ;;  %881 = vmatpush.msrb.mxu0 %v852_v58 }
 0x625   :  { %1034 = vmatmul.msk.f32.vlgmr.msra.gmra.mxu0 %vm94_vm1, %v633_v0  ;;  %v898_v0 = vld [vmem:[%s1494_s5 + $0x38] sm:$0xff] }
 0x626   :  { %v800_v42 = vmul.f32 %v1101_v37, %v799_v41  ;;  %918 = vmatpush.msra.mxu2 %v898_v0 }
 0x628   :  { %v801_v44 = vadd.f32 %v1101_v37, %v800_v42 }
 0x642   :  { %v404_v13 = vpop.f32.mrf.mxu1 }
 0x643   :  { %416 = vrot.lane.b32.xlu1 %v404_v13, %s1177_s25  ;;  %v897_v13 = vld [vmem:[%s1494_s5 + $0x30] sm:$0xff] }
 0x644   :  { %919 = vmatpush.msra.mxu2 %v897_v13 }
 0x646   :  { %920 = vmatpush.msra.mxu2 %v896_v14 }
 0x690   :  { %v578_v63 = vpop.f32.mrf.mxu1 }
 0x691   :  { %740 = vrot.lane.b32.xlu2 %v578_v63, %s1164_s23  ;;  %v895_v63 = vld [vmem:[%s1494_s5 + $0x20] sm:$0xff] }
 0x692   :  { %921 = vmatpush.msra.mxu2 %v895_v63 }
 0x698   :  { %v736_v17 = vpop.f32.mrf.mxu1 }
 0x699   :  { %748 = vrot.lane.b32.xlu1 %v736_v17, %s1177_s25  ;;  %v894_v17 = vld [vmem:[%s1494_s5 + $0x18] sm:$0xff]  ;;  %s999_s25 = sshll.u32 %s1500_s11, 4  ;;  %s1000_s25 = int_to_ptr.hbm [resolvable:$true] %s999_s25 }
 0x69a   :  { %v499_v18 = vpop.f32.mrf.mxu0  ;;  %922 = vmatpush.msra.mxu2 %v894_v17 }
 0x6a2   :  { %v657_v19 = vpop.f32.mrf.mxu0 }
 0x6a3   :  { %744 = vrot.lane.b32.xlu0 %v657_v19, %s1176_s24 }
 0x6b5   :  { %v417_v23 = vpop.permute.xlu1 %416 }
 0x6b6   :  { %v423_v24 = vsel %vm422_vm7, %v421_v22, %v417_v23 }
 0x6b7   :  { %1038 = vmatmul.msk.f32.vlgmr.msra.gmra.mxu3 %vm61_vm0, %v423_v24 }
 0x6eb   :  { %v741_v25 = vpop.permute.xlu2 %740 }
 0x6ec   :  { %v751_v26 = vsel %vm94_vm1, %v499_v18, %v741_v25  ;;  %vm802_vm1 = vweird.f32 %v1101_v37 }
 0x6ed   :  { %v1409_v45 = vsel %vm802_vm1, %v1101_v37, %v801_v44 }
 0x70b   :  { %v749_v28 = vpop.permute.xlu1 %748 }
 0x715   :  { %v745_v27 = vpop.permute.xlu0 %744 }
 0x716   :  { %v752_v29 = vsel %vm420_vm6, %v751_v26, %v745_v27  ;;  %v893_v26 = vld [vmem:[%s1494_s5 + $0x10] sm:$0xff] }
 0x717   :  { %v753_v30 = vsel %vm422_vm7, %v752_v29, %v749_v28  ;;  %923 = vmatpush.msra.mxu2 %v893_v26  ;;  %v892_v28 = vld [vmem:[%s1494_s5 + $0x8] sm:$0xff]  ;;  %v891_v29 = vld [vmem:[%s1494_s5] sm:$0xff] }
 0x718   :  { %1039 = vmatmul.msk.f32.gmra.mxu3 %vm61_vm0, %v753_v30  ;;  %v1064_v30 = vld [vmem:[%s1493_s4] ss:$0 sm:$0xff] }
 0x719   :  { %924 = vmatpush.msra.mxu2 %v892_v28 }
 0x71b   :  { %925 = vmatpush.msra.mxu2 %v891_v29 }
 0x73a   :  { %v781_v31 = vpop.f32.mrf.mxu3 }
 0x73b   :  { %v787_v33 = vadd.f32 %v781_v31, %v1258_v4 }
 0x73d   :  { %v791_v34 = vsel %vm61_vm0, %v787_v33, 0.0 }
 0x73e   :  { %792 = vadd.xlane.f32.xlu2 %v791_v34 }
 0x79b   :  { %v784_v36 = vpop.f32.mrf.mxu3 }
 0x79c   :  { %v788_v38 = vadd.f32 %v784_v36, %v1288_v35 }
 0x79e   :  { %v794_v39 = vsel %vm61_vm0, %v788_v38, 0.0 }
 0x79f   :  { %795 = vadd.xlane.f32.xlu0 %v794_v39 }
 0x7b1   :  { %v793_v4 = vpop.xlane.xlu2 %792 }
 0x7b2   :  { %v804_v46 = vmul.f32 %v1409_v45, %v793_v4 }
 0x7b4   :  { %v806_v47 = vsub.f32 %v787_v33, %v804_v46 }
 0x7b6   :  { %v808_v48 = vmul.f32 %v806_v47, %v806_v47 }
 0x7b8   :  { %v810_v49 = vsel %vm61_vm0, %v808_v48, 0.0 }
 0x7b9   :  { %811 = vadd.xlane.f32.xlu1 %v810_v49 }
 0x812   :  { %v796_v50 = vpop.xlane.xlu0 %795 }
 0x813   :  { %v805_v35 = vmul.f32 %v1409_v45, %v796_v50 }
 0x815   :  { %v807_v51 = vsub.f32 %v788_v38, %v805_v35  ;;  %v1065_v38 = vld [vmem:[%s1495_s6] ss:$0 sm:$0xff] }
 0x817   :  { %v809_v53 = vmul.f32 %v807_v51, %v807_v51 }
 0x819   :  { %v813_v54 = vsel %vm61_vm0, %v809_v53, 0.0 }
 0x81a   :  { %814 = vadd.xlane.f32.xlu2 %v813_v54 }
 0x82c   :  { %v812_v52 = vpop.xlane.xlu1 %811 }
 0x82d   :  { %v816_v59 = vmul.f32 %v812_v52, %v1409_v45 }
 0x82f   :  { %v818_v60 = vadd.f32 1e-05, %v816_v59 }
 0x831   :  { %1102 = vrsqrt.f32 %v818_v60  ;;  %vm826_vm9 = vweird.f32 %v818_v60 }
 0x837   :  { %v1103_v61 = vpop.eup %1102 }
 0x838   :  { %v821_v62 = vmul.f32 %v1103_v61, %v818_v60  ;;  %vm827_vm8 = vweird.f32 %v1103_v61 }
 0x839   :  { %vm828_vm10 = vmor %vm826_vm9, %vm827_vm8 }
 0x83a   :  { %v822_v5 = vmul.f32 %v1103_v61, %v821_v62 }
 0x83c   :  { %v823_v1 = vmul.f32 0.5, %v822_v5 }
 0x83e   :  { %v824_v3 = vsub.f32 1.5, %v823_v1 }
 0x840   :  { %v825_v6 = vmul.f32 %v1103_v61, %v824_v3 }
 0x842   :  { %v829_v8 = vsel %vm828_vm10, %v1103_v61, %v825_v6  ;;  %v1066_v6 = vld [vmem:[%s1498_s9] ss:$0 sm:$0xff]  ;;  %s1179_s9 = smov [#allocation5]  }
 0x843   :  { %v840_v9 = vmul.f32 %v829_v8, %v806_v47 }
 0x845   :  { %v845_v11 = vmul.f32 %v1062_v7, %v840_v9  ;;  %v1067_v9 = vld [vmem:[%s1499_s10] ss:$0 sm:$0xff]  ;;  %s997_s10 = sshll.u32 %s1179_s9, 4  ;;  %s998_s10 = int_to_ptr.vmem [resolvable:$true] %s997_s10 }
 0x847   :  { %v850_v12 = vadd.f32 %v1063_v10, %v845_v11 }
 0x849   :  { %1040 = vmatmul.msk.f32.vlgmr.msrb.gmra.mxu0 %vm61_vm0, %v850_v12 }
 0x88d   :  { %v815_v2 = vpop.xlane.xlu2 %814 }
 0x88e   :  { %v817_v15 = vmul.f32 %v815_v2, %v1409_v45 }
 0x890   :  { %v819_v16 = vadd.f32 1e-05, %v817_v15 }
 0x892   :  { %1104 = vrsqrt.f32 %v819_v16  ;;  %vm836_vm12 = vweird.f32 %v819_v16 }
 0x898   :  { %v1105_v18 = vpop.eup %1104 }
 0x899   :  { %v831_v19 = vmul.f32 %v1105_v18, %v819_v16  ;;  %vm837_vm11 = vweird.f32 %v1105_v18 }
 0x89a   :  { %vm838_vm13 = vmor %vm836_vm12, %vm837_vm11 }
 0x89b   :  { %v832_v43 = vmul.f32 %v1105_v18, %v831_v19 }
 0x89d   :  { %v833_v20 = vmul.f32 0.5, %v832_v43 }
 0x89f   :  { %v834_v21 = vsub.f32 1.5, %v833_v20 }
 0x8a1   :  { %v835_v22 = vmul.f32 %v1105_v18, %v834_v21 }
 0x8a3   :  { %v839_v23 = vsel %vm838_vm13, %v1105_v18, %v835_v22 }
 0x8a4   :  { %v841_v24 = vmul.f32 %v839_v23, %v807_v51 }
 0x8a6   :  { %v846_v25 = vmul.f32 %v1062_v7, %v841_v24 }
 0x8a8   :  { %v851_v27 = vadd.f32 %v1063_v10, %v846_v25 }
 0x8aa   :  { %1041 = vmatmul.msk.f32.gmra.mxu0 %vm61_vm0, %v851_v27 }
 0x8c6   :  { %v883_v31 = vpop.f32.mrf.mxu0 }
 0x8c7   :  { %v884_v33 = vadd.f32 %v1064_v30, %v883_v31 }
 0x8c9   :  { %v889_v34 = vmax.f32 %v884_v33, 0.0 }
 0x8cb   :  { %1042 = vmatmul.msk.f32.vlgmr.msra.gmra.mxu2 %vm903_vm14, %v889_v34 }
 0x927   :  { %v886_v32 = vpop.f32.mrf.mxu0 }
 0x928   :  { %v887_v36 = vadd.f32 %v1064_v30, %v886_v32 }
 0x92a   :  { %v890_v37 = vmax.f32 %v887_v36, 0.0 }
 0x92c   :  { %1043 = vmatmul.msk.f32.gmra.mxu2 %vm903_vm14, %v890_v37 }
 0x94e   :  { %v927_v39 = vpop.f32.mrf.mxu2 }
 0x94f   :  { %v928_v40 = vadd.f32 %v1065_v38, %v927_v39 }
 0x951   :  { %v933_v41 = vadd.f32 %v928_v40, %v850_v12 }
 0x953   :  { %v937_v42 = vsel %vm61_vm0, %v933_v41, 0.0 }
 0x954   :  { %938 = vadd.xlane.f32.xlu0 %v937_v42 }
 0x9af   :  { %v930_v44 = vpop.f32.mrf.mxu2 }
 0x9b0   :  { %v931_v4 = vadd.f32 %v1065_v38, %v930_v44 }
 0x9b2   :  { %v934_v46 = vadd.f32 %v931_v4, %v851_v27 }
 0x9b4   :  { %v940_v47 = vsel %vm61_vm0, %v934_v46, 0.0 }
 0x9b5   :  { %941 = vadd.xlane.f32.xlu1 %v940_v47 }
 0x9c7   :  { %v939_v48 = vpop.xlane.xlu0 %938 }
 0x9c8   :  { %v943_v49 = vmul.f32 %v939_v48, %v1409_v45 }
 0x9ca   :  { %v945_v50 = vsub.f32 %v933_v41, %v943_v49 }
 0x9cc   :  { %v947_v35 = vmul.f32 %v945_v50, %v945_v50 }
 0x9ce   :  { %v949_v51 = vsel %vm61_vm0, %v947_v35, 0.0 }
 0x9cf   :  { %950 = vadd.xlane.f32.xlu2 %v949_v51 }
 0xa28   :  { %v942_v53 = vpop.xlane.xlu1 %941 }
 0xa29   :  { %v944_v54 = vmul.f32 %v942_v53, %v1409_v45 }
 0xa2b   :  { %v946_v55 = vsub.f32 %v934_v46, %v944_v54 }
 0xa2d   :  { %v948_v56 = vmul.f32 %v946_v55, %v946_v55 }
 0xa2f   :  { %v952_v57 = vsel %vm61_vm0, %v948_v56, 0.0 }
 0xa30   :  { %953 = vadd.xlane.f32.xlu0 %v952_v57 }
 0xa42   :  { %v951_v58 = vpop.xlane.xlu2 %950 }
 0xa43   :  { %v955_v52 = vmul.f32 %v951_v58, %v1409_v45 }
 0xa45   :  { %v957_v59 = vadd.f32 1e-05, %v955_v52 }
 0xa47   :  { %1106 = vrsqrt.f32 %v957_v59  ;;  %vm965_vm2 = vweird.f32 %v957_v59 }
 0xa4d   :  { %v1107_v60 = vpop.eup %1106 }
 0xa4e   :  { %v960_v61 = vmul.f32 %v1107_v60, %v957_v59  ;;  %vm966_vm15 = vweird.f32 %v1107_v60 }
 0xa4f   :  { %vm967_vm3 = vmor %vm965_vm2, %vm966_vm15 }
 0xa50   :  { %v961_v62 = vmul.f32 %v1107_v60, %v960_v61 }
 0xa52   :  { %v962_v5 = vmul.f32 0.5, %v961_v62 }
 0xa54   :  { %v963_v1 = vsub.f32 1.5, %v962_v5 }
 0xa56   :  { %v964_v3 = vmul.f32 %v1107_v60, %v963_v1 }
 0xa58   :  { %v968_v7 = vsel %vm967_vm3, %v1107_v60, %v964_v3 }
 0xa59   :  { %v979_v8 = vmul.f32 %v968_v7, %v945_v50 }
 0xa5b   :  { %v984_v10 = vmul.f32 %v1066_v6, %v979_v8 }
 0xa5d   :  { %v989_v11 = vadd.f32 %v1067_v9, %v984_v10 }
 0xa5f   :  { %991 = vst.msk [vmem:[#allocation5] sm:$0xff] %vm61_vm0, %v989_v11 }
 0xaa3   :  { %v954_v12 = vpop.xlane.xlu0 %953 }
 0xaa4   :  { %v956_v0 = vmul.f32 %v954_v12, %v1409_v45 }
 0xaa6   :  { %v958_v13 = vadd.f32 1e-05, %v956_v0 }
 0xaa8   :  { %1108 = vrsqrt.f32 %v958_v13  ;;  %vm975_vm5 = vweird.f32 %v958_v13 }
 0xaae   :  { %v1109_v14 = vpop.eup %1108 }
 0xaaf   :  { %v970_v2 = vmul.f32 %v1109_v14, %v958_v13  ;;  %vm976_vm4 = vweird.f32 %v1109_v14 }
 0xab0   :  { %vm977_vm6 = vmor %vm975_vm5, %vm976_vm4 }
 0xab1   :  { %v971_v15 = vmul.f32 %v1109_v14, %v970_v2 }
 0xab3   :  { %v972_v63 = vmul.f32 0.5, %v971_v15 }
 0xab5   :  { %v973_v16 = vsub.f32 1.5, %v972_v63 }
 0xab7   :  { %v974_v17 = vmul.f32 %v1109_v14, %v973_v16 }
 0xab9   :  { %v978_v18 = vsel %vm977_vm6, %v1109_v14, %v974_v17 }
 0xaba   :  { %v980_v19 = vmul.f32 %v978_v18, %v946_v55 }
 0xabc   :  { %v985_v45 = vmul.f32 %v1066_v6, %v980_v19 }
 0xabe   :  { %v990_v43 = vadd.f32 %v1067_v9, %v985_v45 }
 0xac0   :  { %992 = vst.msk [vmem:[#allocation5 + $0x8] sm:$0xff] %vm61_vm0, %v990_v43 }
 0xac1   :  { %1005 = dma.vmem_to_hbm [thread:$0]  %s998_s10, 256, %s1000_s25, [#allocation4], %s1163_s22, %s1163_s22, %s1164_s23  }
 0xac2   :  { %1160 = dma.done.wait [#allocation4], 256  }
 0xac3   :  { %1161 = vsyncadd [#allocation4], 4294967040 }
 0xac4   :  { %1010 = vsyncpa [#allocation3], 1 }
 0xac5   :  { %1011 = vsyncpa [#allocation4], 1 }

</bundles_post_ra>
